<compile_context>
chip_gen: v7x
topology: tpu7x:2x2x1
jax: 0.10.0
libtpu: 0.0.40
codegen_flags: <defaults>
</compile_context>

<pallas_src>
from functools import partial

import jax
import jax.numpy as jnp
from jax.experimental import pallas as pl
from jax.experimental.pallas import tpu as pltpu


# --------------------------------------------------------------------------- #
# Generation detection (splits / VMEM budget)
# --------------------------------------------------------------------------- #
def _device_kind():
    try:
        return (jax.devices()[0].device_kind or "").lower()
    except Exception:
        return ""


def _is_v7x():
    k = _device_kind()
    return ("v7" in k) or ("7x" in k)


def _default_splits():
    # Only v7x (2 TensorCores/chip) benefits from the size-2 "parallel" axis;
    # on single-TC v5e/v6e it is just a serial outer loop.
    return 2 if _is_v7x() else 1


def _vmem_capacity_bytes():
    # Per-TensorCore VMEM: 64 MiB on v7x, 128 MiB on v5e/v6e.
    return (64 if _is_v7x() else 128) * 2**20


# --------------------------------------------------------------------------- #
# Kernel
# --------------------------------------------------------------------------- #
def _nll_kernel(pred_ref, gold_ref, loss_ref, correct_ref,
                loss_acc_ref, corr_acc_ref, *, compute_correct):
    """One (TB, C) batch tile: accumulate NLL(sum) partials + argmax-accuracy."""
    i = pl.program_id(1)                       # batch-tile index (reduction axis)

    @pl.when(i == 0)
    def _init():
        loss_acc_ref[...] = jnp.zeros_like(loss_acc_ref)
        corr_acc_ref[...] = jnp.zeros_like(corr_acc_ref)

    pred = pred_ref[...]                       # (TB, C) f32 log-probs
    gold = gold_ref[...]                       # (TB, 1) i32 labels (-1 => padding)
    tb, c = pred.shape

    col = jax.lax.broadcasted_iota(jnp.int32, (tb, c), 1)   # lane index per column
    onehot = col == gold                                     # (TB, C) bool

    # NLLLoss(reduction='sum') partials.  Padded rows (gold == -1, pred == 0)
    # never match -> contribute 0.  Only a sublane-direction reduction per
    # step (mostly VPU vreg adds); the cross-lane reduce is deferred to the
    # once-per-split flush below.
    picked = jnp.where(onehot, pred, 0.0)
    loss_acc_ref[...] += jnp.sum(picked, axis=0, keepdims=True)

    if compute_correct:
        # argmax with first-max tie-breaking (matches torch.max / jnp.argmax).
        # Scalar `c` as the "no match" filler avoids a constant tile per step.
        row_max = jnp.max(pred, axis=1, keepdims=True)       # (TB, 1)
        is_max = pred == row_max
        argmax_idx = jnp.min(jnp.where(is_max, col, c), axis=1, keepdims=True)
        corr_acc_ref[...] += jnp.sum((argmax_idx == gold).astype(jnp.int32),
                                     axis=0, keepdims=True)

    @pl.when(i == pl.num_programs(1) - 1)
    def _flush():
        loss_ref[0, 0] = -jnp.sum(loss_acc_ref[...])
        correct_ref[0, 0] = jnp.sum(corr_acc_ref[...])


# --------------------------------------------------------------------------- #
# Wrapper
# --------------------------------------------------------------------------- #
def multiclass_loss(pred, gold, *, splits=None, compute_correct=True,
                    vmem_budget_bytes=None, max_block_rows=None):
    """Returns (loss, num_correct) for one batch.

    pred: (B, C) float32 log-probabilities.
    gold: (B,)   integer labels in [0, C) (caller guarantees validity).
    compute_correct=False skips the argmax path and returns num_correct = 0.
    Loss is accumulated as per-tile / per-split f32 partial sums, so results
    may differ from an ordered sum at the ~1e-6 relative level for huge B.
    """
    B, C = pred.shape
    pred = pred.astype(jnp.float32)
    gold2d = gold.astype(jnp.int32).reshape(B, 1)

    # ---- split axis (megacore) -----------------------------------------------
    if splits is None:
        splits = _default_splits()
    splits = max(1, int(splits))
    if B < 16 * splits:          # tiny batches: no point splitting
        splits = 1

    # ---- tile sizing (lane-padding aware, per-generation VMEM budget) --------
    c_pad = ((C + 127) // 128) * 128          # f32 lane padding of a pred row
    pred_row_bytes = c_pad * 4
    gold_row_bytes = 128 * 4                  # (tb,1) i32 block pads to (tb,128)
    row_bytes = pred_row_bytes + gold_row_bytes

    vmem_cap = _vmem_capacity_bytes()
    if vmem_budget_bytes is None:
        # Half of physical per-core VMEM, capped at 64 MiB:
        #   v7x  -> 32 MiB pipeline budget  (~8 MiB pred blocks at small C)
        #   v5e/v6e -> 64 MiB pipeline budget (~15 MiB pred blocks at small C)
        vmem_budget_bytes = min(vmem_cap // 2, 64 * 2**20)
    pipeline_budget = max(2 * 8 * row_bytes, vmem_budget_bytes - 4 * 2**20)

    tb = max(8, (pipeline_budget // (2 * row_bytes) // 8) * 8)   # double-buffered
    if max_block_rows is not None:
        tb = max(8, min(tb, (int(max_block_rows) // 8) * 8))

    per_split = -(-B // splits)                    # ceil(B / splits)
    share = ((per_split + 7) // 8) * 8
    tb = min(tb, max(8, share))                    # never larger than one split
    n_tiles = -(-per_split // tb)
    # Redistribute rows so the last tile is not mostly padding.
    tb = min(tb, ((-(-per_split // n_tiles) + 7) // 8) * 8)
    n_tiles = -(-per_split // tb)
    b_pad = splits * n_tiles * tb

    # ---- pad batch: zero log-probs + gold = -1 contribute nothing ------------
    if b_pad != B:
        pred = jnp.pad(pred, ((0, b_pad - B), (0, 0)))
        gold2d = jnp.pad(gold2d, ((0, b_pad - B), (0, 0)), constant_values=-1)

    # ---- VMEM budget: actual double-buffered footprint + headroom ------------
    pred_block_bytes = tb * pred_row_bytes
    gold_block_bytes = tb * gold_row_bytes
    footprint = 2 * (pred_block_bytes + gold_block_bytes)
    vmem_limit = int(min(vmem_cap - 4 * 2**20,
                         max(footprint + 8 * 2**20, 16 * 2**20)))

    flops_per_elem = 8 if compute_correct else 3
    cost = pl.CostEstimate(
        flops=flops_per_elem * b_pad * C,
        transcendentals=0,
        bytes_accessed=b_pad * pred_row_bytes + b_pad * gold_row_bytes + splits * 8,
    )

    loss_parts, correct_parts = pl.pallas_call(
        partial(_nll_kernel, compute_correct=compute_correct),
        out_shape=(
            jax.ShapeDtypeStruct((splits, 1), jnp.float32),
            jax.ShapeDtypeStruct((splits, 1), jnp.int32),
        ),
        grid=(splits, n_tiles),
        in_specs=[
            pl.BlockSpec((tb, C), lambda p, i: (p * n_tiles + i, 0)),
            pl.BlockSpec((tb, 1), lambda p, i: (p * n_tiles + i, 0)),
        ],
        out_specs=(
            pl.BlockSpec((1, 1), lambda p, i: (p, 0),
                         memory_space=pltpu.MemorySpace.SMEM),
            pl.BlockSpec((1, 1), lambda p, i: (p, 0),
                         memory_space=pltpu.MemorySpace.SMEM),
        ),
        scratch_shapes=[
            pltpu.VMEM((1, C), jnp.float32),   # per-split loss partials
            pltpu.VMEM((1, 1), jnp.int32),     # per-split correct-count partials
        ],
        compiler_params=pltpu.CompilerParams(
            dimension_semantics=("parallel", "arbitrary"),
            vmem_limit_bytes=vmem_limit,
        ),
        cost_estimate=cost,
    )(pred, gold2d)

    return jnp.sum(loss_parts), jnp.sum(correct_parts)


# --------------------------------------------------------------------------- #
# Reference + tests
# --------------------------------------------------------------------------- #
def _reference(log_p, gold):
    b = log_p.shape[0]
    ref_loss = -jnp.sum(log_p[jnp.arange(b), gold])
    ref_correct = jnp.sum((jnp.argmax(log_p, axis=-1) == gold).astype(jnp.int32))
    return ref_loss, ref_correct


if __name__ == "__main__":
    key = jax.random.PRNGKey(0)
    k1, k2, k3, k4 = jax.random.split(key, 4)

    # --- test 1: module-spec shape (batch_l=8, num_label=16) -------------------
    batch_l, num_label = 8, 16
    logits = jax.random.normal(k1, (batch_l, num_label), dtype=jnp.float32)
    log_p = jax.nn.log_softmax(logits, axis=-1)       # pred is already log-probs
    gold = jax.random.randint(k2, (batch_l,), 0, num_label, dtype=jnp.int32)

    loss, num_correct = multiclass_loss(log_p, gold)
    loss = jax.block_until_ready(loss)
    num_correct = jax.block_until_ready(num_correct)
    ref_loss, ref_correct = _reference(log_p, gold)
    assert jnp.allclose(loss, ref_loss, rtol=1e-5, atol=1e-4), (loss, ref_loss)
    assert int(num_correct) == int(ref_correct), (num_correct, ref_correct)

    # --- test 2: ragged batch, small tile -> multi-tile accumulation -----------
    b2, c2 = 300, 20
    logits2 = jax.random.normal(k3, (b2, c2), dtype=jnp.float32)
    log_p2 = jax.nn.log_softmax(logits2, axis=-1)
    gold2 = jax.random.randint(k4, (b2,), 0, c2, dtype=jnp.int32)
    ref_loss2, ref_correct2 = _reference(log_p2, gold2)

    loss2, correct2 = multiclass_loss(log_p2, gold2, max_block_rows=64)
    loss2 = jax.block_until_ready(loss2)
    correct2 = jax.block_until_ready(correct2)
    assert jnp.allclose(loss2, ref_loss2, rtol=1e-5, atol=1e-3), (loss2, ref_loss2)
    assert int(correct2) == int(ref_correct2), (correct2, ref_correct2)

    # --- test 3: explicit splits=2 (exercises the megacore partial-sum path) ---
    loss3, correct3 = multiclass_loss(log_p2, gold2, splits=2, max_block_rows=64)
    loss3 = jax.block_until_ready(loss3)
    correct3 = jax.block_until_ready(correct3)
    assert jnp.allclose(loss3, ref_loss2, rtol=1e-5, atol=1e-3), (loss3, ref_loss2)
    assert int(correct3) == int(ref_correct2), (correct3, ref_correct2)

    # --- test 4: loss-only fast path (accuracy statistic skipped) --------------
    loss4, _ = multiclass_loss(log_p2, gold2, compute_correct=False)
    loss4 = jax.block_until_ready(loss4)
    assert jnp.allclose(loss4, ref_loss2, rtol=1e-5, atol=1e-3), (loss4, ref_loss2)

    print("KERNEL_OK")
</pallas_src>

<mosaic_0001>
module attributes {stable_mosaic.version = 11 : i64} {
  func.func @_nll_kernel(%arg0: i32, %arg1: i32, %arg2: memref<8x16xf32, #tpu.memory_space<vmem>>, %arg3: memref<8x1xi32, #tpu.memory_space<vmem>>, %arg4: memref<1x1xf32, #tpu.memory_space<smem>>, %arg5: memref<1x1xi32, #tpu.memory_space<smem>>, %arg6: memref<1x16xf32, #tpu.memory_space<vmem>>, %arg7: memref<1x1xi32, #tpu.memory_space<vmem>>) attributes {dimension_semantics = [#tpu.dimension_semantics<parallel>, #tpu.dimension_semantics<arbitrary>], iteration_bounds = array<i64: 1, 1>, scalar_prefetch = 0 : i64, scratch_operands = 2 : i64, tpu.core_type = #tpu.core_type<tc>, window_params = [{transform_indices = @transform_0, window_bounds = array<i64: 8, 16>}, {transform_indices = @transform_1, window_bounds = array<i64: 8, 1>}, {transform_indices = @transform_2, window_bounds = array<i64: 1, 1>}, {transform_indices = @transform_3, window_bounds = array<i64: 1, 1>}]} {
    %c0_i32 = arith.constant 0 : i32
    %0 = arith.cmpi eq, %arg1, %c0_i32 : i32
    %1 = arith.extui %0 : i1 to i32
    %c0_i32_0 = arith.constant 0 : i32
    %2 = arith.cmpi ne, %1, %c0_i32_0 : i32
    scf.if %2 {
      %cst_18 = arith.constant 0.000000e+00 : f32
      %33 = vector.broadcast %cst_18 : f32 to vector<1x16xf32>
      %c0_19 = arith.constant 0 : index
      %c0_20 = arith.constant 0 : index
      %34 = vector.load %arg6[%c0_19, %c0_20] : memref<1x16xf32, #tpu.memory_space<vmem>>, vector<1x16xf32>
      tpu.vector_store %arg6[%c0_19, %c0_20], %33 {strides = array<i32>} : memref<1x16xf32, #tpu.memory_space<vmem>>, vector<1x16xf32>,
      %c0_i32_21 = arith.constant 0 : i32
      %35 = vector.broadcast %c0_i32_21 : i32 to vector<1x1xi32>
      %c0_22 = arith.constant 0 : index
      %c0_23 = arith.constant 0 : index
      %36 = vector.load %arg7[%c0_22, %c0_23] : memref<1x1xi32, #tpu.memory_space<vmem>>, vector<1x1xi32>
      tpu.vector_store %arg7[%c0_22, %c0_23], %35 {strides = array<i32>} : memref<1x1xi32, #tpu.memory_space<vmem>>, vector<1x1xi32>,
    } else {
    }
    %c0 = arith.constant 0 : index
    %c0_1 = arith.constant 0 : index
    %3 = vector.load %arg2[%c0, %c0_1] : memref<8x16xf32, #tpu.memory_space<vmem>>, vector<8x16xf32>
    %c0_2 = arith.constant 0 : index
    %c0_3 = arith.constant 0 : index
    %4 = vector.load %arg3[%c0_2, %c0_3] : memref<8x1xi32, #tpu.memory_space<vmem>>, vector<8x1xi32>
    %5 = tpu.iota {dimensions = array<i32: 1>} : vector<8x16xi32>
    %6 = vector.broadcast %4 : vector<8x1xi32> to vector<8x16xi32>
    %7 = arith.cmpi eq, %5, %6 : vector<8x16xi32>
    %cst = arith.constant 0.000000e+00 : f32
    %8 = vector.broadcast %cst : f32 to vector<8x16xf32>
    %9 = arith.select %7, %3, %8 : vector<8x16xi1>, vector<8x16xf32>
    %c0_4 = arith.constant 0 : index
    %c0_5 = arith.constant 0 : index
    %10 = vector.load %arg6[%c0_4, %c0_5] : memref<1x16xf32, #tpu.memory_space<vmem>>, vector<1x16xf32>
    %cst_6 = arith.constant dense<0.000000e+00> : vector<16xf32>
    %11 = vector.multi_reduction <add>, %9, %cst_6 [0] : vector<8x16xf32> to vector<16xf32>
    %12 = vector.shape_cast %11 : vector<16xf32> to vector<1x16xf32>
    %13 = arith.addf %10, %12 : vector<1x16xf32>
    %c0_7 = arith.constant 0 : index
    %c0_8 = arith.constant 0 : index
    %14 = vector.load %arg6[%c0_7, %c0_8] : memref<1x16xf32, #tpu.memory_space<vmem>>, vector<1x16xf32>
    tpu.vector_store %arg6[%c0_7, %c0_8], %13 {strides = array<i32>} : memref<1x16xf32, #tpu.memory_space<vmem>>, vector<1x16xf32>,
    %cst_9 = arith.constant dense<0xFF800000> : vector<8xf32>
    %15 = vector.multi_reduction <maximumf>, %3, %cst_9 [1] : vector<8x16xf32> to vector<8xf32>
    %16 = vector.shape_cast %15 : vector<8xf32> to vector<8x1xf32>
    %17 = vector.broadcast %16 : vector<8x1xf32> to vector<8x16xf32>
    %18 = arith.cmpf oeq, %3, %17 : vector<8x16xf32>
    %c16_i32 = arith.constant 16 : i32
    %19 = vector.broadcast %c16_i32 : i32 to vector<8x16xi32>
    %20 = arith.select %18, %5, %19 : vector<8x16xi1>, vector<8x16xi32>
    %cst_10 = arith.constant dense<2147483647> : vector<8xi32>
    %21 = vector.multi_reduction <minsi>, %20, %cst_10 [1] : vector<8x16xi32> to vector<8xi32>
    %22 = vector.shape_cast %21 : vector<8xi32> to vector<8x1xi32>
    %c0_11 = arith.constant 0 : index
    %c0_12 = arith.constant 0 : index
    %23 = vector.load %arg7[%c0_11, %c0_12] : memref<1x1xi32, #tpu.memory_space<vmem>>, vector<1x1xi32>
    %24 = arith.cmpi eq, %22, %4 : vector<8x1xi32>
    %25 = arith.extui %24 : vector<8x1xi1> to vector<8x1xi32>
    %cst_13 = arith.constant dense<0> : vector<1xi32>
    %26 = vector.multi_reduction <add>, %25, %cst_13 [0] : vector<8x1xi32> to vector<1xi32>
    %27 = vector.shape_cast %26 : vector<1xi32> to vector<1x1xi32>
    %28 = arith.addi %23, %27 : vector<1x1xi32>
    %c0_14 = arith.constant 0 : index
    %c0_15 = arith.constant 0 : index
    %29 = vector.load %arg7[%c0_14, %c0_15] : memref<1x1xi32, #tpu.memory_space<vmem>>, vector<1x1xi32>
    tpu.vector_store %arg7[%c0_14, %c0_15], %28 {strides = array<i32>} : memref<1x1xi32, #tpu.memory_space<vmem>>, vector<1x1xi32>,
    %c0_i32_16 = arith.constant 0 : i32
    %30 = arith.cmpi eq, %arg1, %c0_i32_16 : i32
    %31 = arith.extui %30 : i1 to i32
    %c0_i32_17 = arith.constant 0 : i32
    %32 = arith.cmpi ne, %31, %c0_i32_17 : i32
    scf.if %32 {
      %c0_18 = arith.constant 0 : index
      %c0_19 = arith.constant 0 : index
      %33 = vector.load %arg6[%c0_18, %c0_19] : memref<1x16xf32, #tpu.memory_space<vmem>>, vector<1x16xf32>
      %34 = vector.shape_cast %33 : vector<1x16xf32> to vector<1x1x16xf32>
      %cst_20 = arith.constant dense<0.000000e+00> : vector<1xf32>
      %35 = vector.multi_reduction <add>, %34, %cst_20 [1, 2] : vector<1x1x16xf32> to vector<1xf32>
      %36 = vector.shape_cast %35 : vector<1xf32> to vector<1x1x1xf32>
      %37 = vector.extract %36[0, 0, 0] : f32 from vector<1x1x1xf32>
      %cst_21 = arith.constant 0.000000e+00 : f32
      %38 = arith.subf %cst_21, %37 : f32
      %c0_22 = arith.constant 0 : index
      %c0_23 = arith.constant 0 : index
      %39 = memref.load %arg4[%c0_22, %c0_23] : memref<1x1xf32, #tpu.memory_space<smem>>
      memref.store %38, %arg4[%c0_22, %c0_23] : memref<1x1xf32, #tpu.memory_space<smem>>
      %c0_24 = arith.constant 0 : index
      %c0_25 = arith.constant 0 : index
      %40 = vector.load %arg7[%c0_24, %c0_25] : memref<1x1xi32, #tpu.memory_space<vmem>>, vector<1x1xi32>
      %41 = vector.shape_cast %40 : vector<1x1xi32> to vector<1x1x1xi32>
      %cst_26 = arith.constant dense<0> : vector<1xi32>
      %42 = vector.multi_reduction <add>, %41, %cst_26 [1, 2] : vector<1x1x1xi32> to vector<1xi32>
      %43 = vector.shape_cast %42 : vector<1xi32> to vector<1x1x1xi32>
      %44 = vector.extract %43[0, 0, 0] : i32 from vector<1x1x1xi32>
      %c0_27 = arith.constant 0 : index
      %c0_28 = arith.constant 0 : index
      %45 = memref.load %arg5[%c0_27, %c0_28] : memref<1x1xi32, #tpu.memory_space<smem>>
      memref.store %44, %arg5[%c0_27, %c0_28] : memref<1x1xi32, #tpu.memory_space<smem>>
    } else {
    }
    return
  }
  func.func @transform_0(%arg0: i32, %arg1: i32) -> (i32, i32) {
    %c1_i32 = arith.constant 1 : i32
    %0 = arith.muli %arg0, %c1_i32 : i32
    %1 = arith.addi %0, %arg1 : i32
    %c0_i32 = arith.constant 0 : i32
    %c0_i32_0 = arith.constant 0 : i32
    return %1, %c0_i32 : i32, i32
  }
  func.func @transform_1(%arg0: i32, %arg1: i32) -> (i32, i32) {
    %c1_i32 = arith.constant 1 : i32
    %0 = arith.muli %arg0, %c1_i32 : i32
    %1 = arith.addi %0, %arg1 : i32
    %c0_i32 = arith.constant 0 : i32
    %c0_i32_0 = arith.constant 0 : i32
    return %1, %c0_i32 : i32, i32
  }
  func.func @transform_2(%arg0: i32, %arg1: i32) -> (i32, i32) {
    %c0_i32 = arith.constant 0 : i32
    %c0_i32_0 = arith.constant 0 : i32
    return %arg0, %c0_i32 : i32, i32
  }
  func.func @transform_3(%arg0: i32, %arg1: i32) -> (i32, i32) {
    %c0_i32 = arith.constant 0 : i32
    %c0_i32_0 = arith.constant 0 : i32
    return %arg0, %c0_i32 : i32, i32
  }
}

</mosaic_0001>

<bundles_post_ra>
// kernel: tpu_custom_call.1
= control target key start
LH: loop header
LB: loop body
LE: loop exit
PB: predicated region body
PF: predicated region fallthrough
CT: control target
= control target key end

     0   :  { %9 = vsyncpa [#allocation5], 0  ;;  %vm67_vm0 = vcmask 130048   ;;  %s265_s0 = inlined_call_operand.vmem [shape: f32[8,16], index: 0, kind: input, shape index: {}]   ;;  %s266_s1 = inlined_call_operand.vmem [shape: s32[8,1], index: 1, kind: input, shape index: {}]   ;;  %s267_s2 = inlined_call_operand.hbm [shape: f32[1,1], index: 2, kind: output, shape index: {0}]   ;;  %s268_s3 = inlined_call_operand.hbm [shape: s32[1,1], index: 3, kind: output, shape index: {1}]  }
   0x1   :  { %v57_v0 = vld [vmem:[%s265_s0] sm:$0xff] }
   0x2   :  { %10 = vsyncpa [#allocation7], 0  ;;  %v78_v1 = vsel %vm67_vm0, %v57_v0, -inf  ;;  %v203_v2 = vmov 0   ;;  %vm55_vm1 = vcmask 0   ;;  %v58_v3 = vld [vmem:[%s266_s1] sm:$0xff]  ;;  %v59_v4 = vlaneseq }
   0x3   :  { %79 = vmax.xlane.f32.xlu0 %v78_v1  ;;  %56 = vst.msk [vmem:[#allocation3] sm:$0x1] %vm55_vm1, %v203_v2  ;;  %vm53_vm3 = vcmask 122880   ;;  %v204_v12 = vmov 0.0   ;;  %vm101_vm6 = vcmask 7168   ;;  %s179_s18 = scalar_lea.hbm %s267_s2, 16 }
   0x4   :  { %178 = vset.pattern.permute.xlu0 %v203_v2  ;;  %v60_v5 = vand.u32 127, %v59_v4  ;;  %54 = vst.msk [vmem:[#allocation2] sm:$0x1] %vm53_vm3, %v204_v12  ;;  %p180_p0 = scmp.ne.s32.totalorder %s267_s2, %s179_s18  ;;  %p183_p1 = scmp.lt.u32.totalorder %s179_s18, %s267_s2 }
   0x6   :  { %p185_p2 = pnand %p183_p1, %p180_p0 }
   0xa   :  { %v98_v48 = vld [vmem:[#allocation3] sm:$0x1] }
   0xb   :  { %v66_v20 = vld [vmem:[#allocation2] sm:$0x1] }
  0x19   :  { %62 = vperm.xlu0 %178, %v58_v3  }
  0x90   :  { %v80_v6 = vpop.xlane.xlu0 %79 }
  0x91   :  { %vm81_vm2 = vcmp.eq.f32.partialorder %v57_v0, %v80_v6 }
  0x92   :  { %v82_v7 = vsel %vm81_vm2, %v60_v5, 16 }
  0x93   :  { %v83_v8 = vsel %vm67_vm0, %v82_v7, 2147483647 }
  0x94   :  { %v85_v9 = vshra.s32 %v83_v8, 16  ;;  %v84_v23 = vand.u32 65535, %v83_v8 }
  0x96   :  { %v87_v10 = vcvt.s32.f32 %v85_v9  ;;  %v86_v25 = vcvt.s32.f32 %v84_v23 }
  0x98   :  { %88 = vmin.xlane.f32.xlu1 %v87_v10  ;;  %v63_v11 = vpop.permute.xlu0 %62 }
  0x99   :  { %vm64_vm4 = vcmp.eq.s32.totalorder %v60_v5, %v63_v11 }
  0x9a   :  { %v65_v13 = vsel %vm64_vm4, %v57_v0, 0.0 }
  0x9b   :  { %v68_v14 = vsel %vm67_vm0, %v65_v13, 0.0 }
  0x9c   :  { %v69_v15 = vrot.slane %v68_v14, 4 }
  0x9e   :  { %v70_v16 = vadd.f32 %v69_v15, %v68_v14 }
  0xa0   :  { %v71_v17 = vrot.slane %v70_v16, 2 }
  0xa2   :  { %v72_v18 = vadd.f32 %v71_v17, %v70_v16 }
  0xa4   :  { %v73_v19 = vrot.slane %v72_v18, 1 }
  0xa6   :  { %v74_v21 = vadd.f32 %v73_v19, %v72_v18 }
  0xa8   :  { %v75_v22 = vadd.f32 %v74_v21, %v66_v20 }
  0xaa   :  { %77 = vst.msk [vmem:[#allocation2] sm:$0x1] %vm53_vm3, %v75_v22 }
  0xb1   :  { %v115_v26 = vld [vmem:[#allocation2] sm:$0x1] }
  0xb2   :  { %v116_v28 = vsel %vm53_vm3, %v115_v26, 0.0 }
 0x125   :  { %v89_v24 = vpop.xlane.xlu1 %88 }
 0x126   :  { %vm90_vm5 = vcmp.eq.f32.partialorder %v87_v10, %v89_v24  ;;  %v95_v29 = vcvt.f32.s32 %v89_v24 }
 0x127   :  { %v91_v27 = vsel %vm90_vm5, %v86_v25, inf }
 0x128   :  { %92 = vmin.xlane.f32.xlu1 %v91_v27  ;;  %v96_v31 = vshll.u32 %v95_v29, 16 }
 0x12c   :  { %117 = vadd.xlane.f32.xlu1 %v116_v28 }
 0x1b5   :  { %v93_v30 = vpop.xlane.xlu1 %92 }
 0x1b6   :  { %v94_v32 = vcvt.f32.s32 %v93_v30 }
 0x1b8   :  { %v97_v33 = vadd.s32 %v96_v31, %v94_v32 }
 0x1b9   :  { %v118_v34 = vpop.xlane.xlu1 %117 }
 0x1ba   :  { %vm99_vm7 = vcmp.eq.s32.totalorder %v97_v33, %v58_v3  ;;  %v119_v35 = vrot.slane %v118_v34, 4 }
 0x1bb   :  { %v100_v36 = vsel %vm99_vm7, 1, %v203_v2 }
 0x1bc   :  { %v102_v37 = vsel %vm101_vm6, %v100_v36, 0  ;;  %v120_v38 = vadd.f32 %v119_v35, %v118_v34 }
 0x1bd   :  { %v103_v39 = vrot.slane %v102_v37, 4 }
 0x1be   :  { %v121_v40 = vrot.slane %v120_v38, 2 }
 0x1bf   :  { %v104_v41 = vadd.s32 %v103_v39, %v102_v37 }
 0x1c0   :  { %v122_v42 = vadd.f32 %v121_v40, %v120_v38 }
 0x1c1   :  { %v105_v43 = vrot.slane %v104_v41, 2 }
 0x1c2   :  { %v123_v44 = vrot.slane %v122_v42, 1 }
 0x1c3   :  { %v106_v45 = vadd.s32 %v105_v43, %v104_v41 }
 0x1c4   :  { %v124_v46 = vadd.f32 %v123_v44, %v122_v42 }
 0x1c5   :  { %v107_v47 = vrot.slane %v106_v45, 1 }
 0x1c6   :  { %170 = vpush %v124_v46 }
 0x1c7   :  { %v108_v49 = vadd.s32 %v107_v47, %v106_v45 }
 0x1c9   :  { %v109_v50 = vadd.s32 %v108_v49, %v98_v48 }
 0x1cb   :  { %111 = vst.msk [vmem:[#allocation3] sm:$0x1] %vm55_vm1, %v109_v50 }
 0x1d2   :  { %v129_v51 = vld [vmem:[#allocation3] sm:$0x1] }
 0x1d3   :  { %172 = vpush %v129_v51 }
 0x1f7   :  { %s171_s0 = spop %170 }
 0x1f8   :  { %s126_s1 = ssub.f32 0.0, %s171_s0 }
 0x1fa   :  { %128 = sst [smem:[#allocation4]] %s126_s1 }
 0x1fb   :  { %188 = shalt.err (!%p185_p2)
}
 0x1fc   :  { %s205_s23 = smov [#allocation4]   ;;  %s189_s29 = scalar_lea.hbm %s268_s3, 16 }
 0x1fd   :  { %140 = dma.smem_to_hbm %s205_s23, 16, %s267_s2, [#allocation5]  }
 0x1fe   :  { %p190_p3 = scmp.ne.s32.totalorder %s268_s3, %s189_s29  ;;  %p193_p4 = scmp.lt.u32.totalorder %s189_s29, %s268_s3 }
 0x200   :  { %p195_p5 = pnand %p193_p4, %p190_p3 }
 0x204   :  { %s173_s26 = spop %172 }
 0x205   :  { %132 = sst [smem:[#allocation6]] %s173_s26 }
 0x206   :  { %198 = shalt.err (!%p195_p5)
}
 0x207   :  { %s206_s7 = smov [#allocation6]  }
 0x208   :  { %148 = dma.smem_to_hbm %s206_s7, 16, %s268_s3, [#allocation7]  }
 0x209   :  { %199 = dma.done.wait [#allocation5], 16  }
 0x20a   :  { %200 = vsyncadd [#allocation5], 4294967280 }
 0x20b   :  { %201 = dma.done.wait [#allocation7], 16  }
 0x20c   :  { %202 = vsyncadd [#allocation7], 4294967280 }
 0x20d   :  { %155 = sfence }
 0x20e   :  { %156 = vsyncpa [#allocation5], 1 }
 0x20f   :  { %157 = vsyncpa [#allocation7], 1 }

</bundles_post_ra>
